<compile_context>
chip_gen: v7x
topology: tpu7x:2x2x1
jax: 0.10.0
libtpu: 0.0.40
codegen_flags: <defaults>
</compile_context>

<pallas_src>
import math

import jax
import jax.numpy as jnp
from jax.experimental import pallas as pl
from jax.experimental.pallas import tpu as pltpu


NEG_INF = -1e30          # large finite mask value (avoids exp(-inf - -inf) = NaN)


def _tpu_config():
    """Generation-aware VMEM budget and attention tile cap."""
    try:
        vmem_phys = int(pltpu.get_tpu_info().vmem_capacity_bytes)
    except Exception:
        vmem_phys = 0
    if vmem_phys > 64 * 1024 * 1024:        # v5e / v6e: 128 MiB physical VMEM
        return {"vmem_limit": 64 * 1024 * 1024, "attn_tile_cap": 512}
    # v7x (64 MiB physical / 32 MiB scoped) or unknown: stay conservative.
    return {"vmem_limit": 32 * 1024 * 1024, "attn_tile_cap": 256}


def _pick_tile(n, cap):
    """Largest tile <= cap that divides n (full array if n <= cap)."""
    if n <= cap:
        return n
    for t in (cap, 512, 256, 128, 64, 32, 16, 8):
        if t <= cap and t <= n and n % t == 0:
            return t
    return n


# ---------------------------------------------------------------------------
# Kernel 1: tiled linear  y = x @ W + b   (row- and D_out-tiled)
# ---------------------------------------------------------------------------
def _linear_kernel(x_ref, w_ref, b_ref, o_ref):
    acc = jnp.dot(x_ref[...], w_ref[...], preferred_element_type=jnp.float32)
    o_ref[...] = (acc + b_ref[...]).astype(o_ref.dtype)


def pallas_linear(x, w, b, out_dtype):
    """x: (N, D_in) bf16, w: (D_in, D_out) bf16 (pre-transposed), b: (1, D_out) f32."""
    n, d_in = x.shape
    d_out = w.shape[1]
    cfg = _tpu_config()
    tn = _pick_tile(n, 256)
    td = _pick_tile(d_out, 512)
    return pl.pallas_call(
        _linear_kernel,
        out_shape=jax.ShapeDtypeStruct((n, d_out), out_dtype),
        grid=(n // tn, d_out // td),
        in_specs=[pl.BlockSpec((tn, d_in), lambda i, j: (i, 0)),
                  pl.BlockSpec((d_in, td), lambda i, j: (0, j)),
                  pl.BlockSpec((1, td), lambda i, j: (0, j))],
        out_specs=pl.BlockSpec((tn, td), lambda i, j: (i, j)),
        compiler_params=pltpu.CompilerParams(
            dimension_semantics=("parallel", "parallel"),
            vmem_limit_bytes=cfg["vmem_limit"]),
    )(x, w, b)


# ---------------------------------------------------------------------------
# Kernel 2: fused Q/K/V projections (cross-attention path; one dispatch)
# ---------------------------------------------------------------------------
def _fused_qkv_kernel(xq_ref, xk_ref, xv_ref, wq_ref, wk_ref, wv_ref,
                      bq_ref, bk_ref, bv_ref, oq_ref, ok_ref, ov_ref):
    def proj(x_ref, w_ref, b_ref, o_ref):
        acc = jnp.dot(x_ref[...], w_ref[...], preferred_element_type=jnp.float32)
        o_ref[...] = (acc + b_ref[...]).astype(o_ref.dtype)
    proj(xq_ref, wq_ref, bq_ref, oq_ref)
    proj(xk_ref, wk_ref, bk_ref, ok_ref)
    proj(xv_ref, wv_ref, bv_ref, ov_ref)


def pallas_fused_qkv(xq, xk, xv, wq, wk, wv, bq, bk, bv):
    n, d_in = xq.shape
    d_out = wq.shape[1]
    cfg = _tpu_config()
    tn = _pick_tile(n, 256)
    td = _pick_tile(d_out, 512)
    x_spec = pl.BlockSpec((tn, d_in), lambda i, j: (i, 0))
    w_spec = pl.BlockSpec((d_in, td), lambda i, j: (0, j))
    b_spec = pl.BlockSpec((1, td), lambda i, j: (0, j))
    o_spec = pl.BlockSpec((tn, td), lambda i, j: (i, j))
    o_shape = jax.ShapeDtypeStruct((n, d_out), jnp.bfloat16)
    # NOTE: for d_model >= ~4096, add a D_in reduction grid axis + f32 acc scratch.
    return pl.pallas_call(
        _fused_qkv_kernel,
        out_shape=(o_shape, o_shape, o_shape),
        grid=(n // tn, d_out // td),
        in_specs=[x_spec, x_spec, x_spec, w_spec, w_spec, w_spec,
                  b_spec, b_spec, b_spec],
        out_specs=(o_spec, o_spec, o_spec),
        compiler_params=pltpu.CompilerParams(
            dimension_semantics=("parallel", "parallel"),
            vmem_limit_bytes=cfg["vmem_limit"]),
    )(xq, xk, xv, wq, wk, wv, bq, bk, bv)


# ---------------------------------------------------------------------------
# Kernel 3a: flash attention, heads in the grid (n_d % 128 == 0)
# ---------------------------------------------------------------------------
def _make_flash_head_kernel(tq, tk, num_kv):
    def kernel(q_ref, k_ref, v_ref, o_ref, m_sc, l_sc, acc_sc):
        # q_ref/o_ref: (1, tq, n_d); k_ref/v_ref: (1, tk, n_d); scale folded into w_q.
        qi = pl.program_id(2)
        ki = pl.program_id(3)

        @pl.when(ki == 0)
        def _init():
            m_sc[...] = jnp.full_like(m_sc, NEG_INF)
            l_sc[...] = jnp.zeros_like(l_sc)
            acc_sc[...] = jnp.zeros_like(acc_sc)

        def block(masked):
            q = q_ref[0]
            k = k_ref[0]
            v = v_ref[0]
            s = jnp.einsum("qd,kd->qk", q, k,
                           preferred_element_type=jnp.float32)       # (tq, tk) f32
            if masked:
                row = qi * tq + jax.lax.broadcasted_iota(jnp.int32, (tq, tk), 0)
                col = ki * tk + jax.lax.broadcasted_iota(jnp.int32, (tq, tk), 1)
                s = jnp.where(row >= col, s, NEG_INF)
            m_prev = m_sc[...]
            m_new = jnp.maximum(m_prev, jnp.max(s, axis=-1, keepdims=True))
            alpha = jnp.exp(m_prev - m_new)
            p = jnp.exp(s - m_new)                                   # f32 (v5e-safe)
            l_sc[...] = alpha * l_sc[...] + jnp.sum(p, axis=-1, keepdims=True)
            acc_sc[...] = alpha * acc_sc[...] + jnp.dot(
                p.astype(v.dtype), v, preferred_element_type=jnp.float32)
            m_sc[...] = m_new

        @pl.when(ki < qi)             # fully below diagonal: no mask needed
        def _full():
            block(False)

        @pl.when(ki == qi)            # diagonal block: apply causal mask
        def _diag():
            block(True)

        @pl.when(ki == num_kv - 1)
        def _finalize():
            inv_l = pl.reciprocal(l_sc[...], approx=True)            # EUP slot
            o_ref[0] = (acc_sc[...] * inv_l).astype(o_ref.dtype)

    return kernel


# ---------------------------------------------------------------------------
# Kernel 3b: flash attention, merged-head layout, static head loop (small n_d)
# ---------------------------------------------------------------------------
def _make_flash_kernel(n_heads, n_d, tq, tk, num_kv):
    def kernel(q_ref, k_ref, v_ref, o_ref, m_sc, l_sc, acc_sc):
        # q_ref/o_ref: (1, tq, D)   k_ref/v_ref: (1, tk, D)   D = n_heads * n_d
        qi = pl.program_id(1)
        ki = pl.program_id(2)

        @pl.when(ki == 0)
        def _init():
            m_sc[...] = jnp.full_like(m_sc, NEG_INF)
            l_sc[...] = jnp.zeros_like(l_sc)
            acc_sc[...] = jnp.zeros_like(acc_sc)

        def block(masked):
            if masked:
                row = qi * tq + jax.lax.broadcasted_iota(jnp.int32, (tq, tk), 0)
                col = ki * tk + jax.lax.broadcasted_iota(jnp.int32, (tq, tk), 1)
                causal = row >= col
            for h in range(n_heads):                     # static unroll over heads
                hs = h * n_d
                q_h = q_ref[0, :, hs:hs + n_d]           # scale already folded in
                k_h = k_ref[0, :, hs:hs + n_d]
                v_h = v_ref[0, :, hs:hs + n_d]
                s = jnp.einsum("qd,kd->qk", q_h, k_h,
                               preferred_element_type=jnp.float32)
                if masked:
                    s = jnp.where(causal, s, NEG_INF)
                m_prev = m_sc[h]                          # (tq, 1) full-tile view
                m_new = jnp.maximum(m_prev, jnp.max(s, axis=-1, keepdims=True))
                alpha = jnp.exp(m_prev - m_new)
                p = jnp.exp(s - m_new)
                l_sc[h] = alpha * l_sc[h] + jnp.sum(p, axis=-1, keepdims=True)
                acc_sc[:, hs:hs + n_d] = alpha * acc_sc[:, hs:hs + n_d] + jnp.dot(
                    p.astype(v_h.dtype), v_h, preferred_element_type=jnp.float32)
                m_sc[h] = m_new

        @pl.when(ki < qi)
        def _full():
            block(False)

        @pl.when(ki == qi)
        def _diag():
            block(True)

        @pl.when(ki == num_kv - 1)
        def _finalize():
            inv_l = pl.reciprocal(l_sc[...], approx=True)   # one reciprocal, all heads
            for h in range(n_heads):
                hs = h * n_d
                acc_sc[:, hs:hs + n_d] = acc_sc[:, hs:hs + n_d] * inv_l[h]
            o_ref[0] = acc_sc[...].astype(o_ref.dtype)      # one lane-dense store

    return kernel


def pallas_flash_attention(q, k, v, n_heads):
    """q/k/v: (B, S, D) bf16 in merged head layout -> (B, S, D) bf16."""
    B, S, D = q.shape
    n_d = D // n_heads
    cfg = _tpu_config()
    tq = _pick_tile(S, cfg["attn_tile_cap"])
    tk = tq
    num_q, num_kv = S // tq, S // tk

    itemsize = jnp.dtype(q.dtype).itemsize
    kv_blocks = num_q * (num_q + 1) // 2            # K/V tiles actually fetched
    cost = pl.CostEstimate(
        flops=int(2 * B * S * S * D),               # causal: ~half of full QK^T + PV
        transcendentals=int(B * n_heads * S * S // 2),
        bytes_accessed=int(B * (2 * S * D + 2 * kv_blocks * tk * D) * itemsize))

    if n_d % 128 == 0:
        # Head-split grid: small lane-aligned tiles, minimal scratch (v7x-friendly).
        kernel = _make_flash_head_kernel(tq, tk, num_kv)
        grid = (B, n_heads, num_q, num_kv)
        q_spec = pl.BlockSpec((1, tq, n_d), lambda b, h, qi, ki: (b, qi, h))
        kv_spec = pl.BlockSpec((1, tk, n_d),
                               lambda b, h, qi, ki: (b, jnp.minimum(ki, qi), h))
        out_spec = pl.BlockSpec((1, tq, n_d), lambda b, h, qi, ki: (b, qi, h))
        scratch = [pltpu.VMEM((tq, 1), jnp.float32),      # running max  m
                   pltpu.VMEM((tq, 1), jnp.float32),      # running sum  l
                   pltpu.VMEM((tq, n_d), jnp.float32)]    # accumulator
        semantics = ("parallel", "parallel", "parallel", "arbitrary")
    else:
        # Merged-head layout with static head unroll (small n_d / small d_model).
        kernel = _make_flash_kernel(n_heads, n_d, tq, tk, num_kv)
        grid = (B, num_q, num_kv)
        q_spec = pl.BlockSpec((1, tq, D), lambda b, qi, ki: (b, qi, 0))
        kv_spec = pl.BlockSpec((1, tk, D),
                               lambda b, qi, ki: (b, jnp.minimum(ki, qi), 0))
        out_spec = pl.BlockSpec((1, tq, D), lambda b, qi, ki: (b, qi, 0))
        scratch = [pltpu.VMEM((n_heads, tq, 1), jnp.float32),
                   pltpu.VMEM((n_heads, tq, 1), jnp.float32),
                   pltpu.VMEM((tq, D), jnp.float32)]
        semantics = ("parallel", "parallel", "arbitrary")

    return pl.pallas_call(
        kernel,
        out_shape=jax.ShapeDtypeStruct((B, S, D), q.dtype),
        grid=grid,
        in_specs=[q_spec, kv_spec, kv_spec],
        out_specs=out_spec,
        scratch_shapes=scratch,
        compiler_params=pltpu.CompilerParams(
            dimension_semantics=semantics,
            vmem_limit_bytes=cfg["vmem_limit"]),
        cost_estimate=cost,
    )(q, k, v)


# ---------------------------------------------------------------------------
# Full module forward (no head-split/merge transposes anywhere)
# ---------------------------------------------------------------------------
def multi_head_attention_forward(params, q, k, v, n_heads):
    B, S, D = q.shape
    N = B * S

    if (q is k) and (k is v):
        # Self-attention: one (N, D) x (D, 3D) GEMM, X read from HBM once.
        x = q.reshape(N, D).astype(jnp.bfloat16)
        qkv = pallas_linear(x, params["w_qkv"], params["b_qkv"], jnp.bfloat16)
        qp, kp, vp = qkv[:, :D], qkv[:, D:2 * D], qkv[:, 2 * D:]
    else:
        xq = q.reshape(N, D).astype(jnp.bfloat16)
        xk = k.reshape(N, D).astype(jnp.bfloat16)
        xv = v.reshape(N, D).astype(jnp.bfloat16)
        qp, kp, vp = pallas_fused_qkv(
            xq, xk, xv,
            params["w_q"], params["w_k"], params["w_v"],
            params["b_q"], params["b_k"], params["b_v"])

    attn = pallas_flash_attention(
        qp.reshape(B, S, D), kp.reshape(B, S, D), vp.reshape(B, S, D), n_heads)

    out = pallas_linear(attn.reshape(N, D), params["w_out"], params["b_out"],
                        out_dtype=jnp.float32)
    return out.reshape(B, S, D)


def init_params(key, d_model, n_heads):
    """nn.Linear-like init.

    Returns (ref_params, kern_params):
      ref_params : f32, unscaled (exactly mirrors the PyTorch module).
      kern_params: bf16 weights pre-transposed (d_in, d_out); 1/sqrt(n_d) folded
                   into w_q/b_q; concatenated (D, 3D) QKV weights for self-attn.
    """
    bound = 1.0 / math.sqrt(d_model)
    keys = jax.random.split(key, 8)

    def w(kk):
        return jax.random.uniform(kk, (d_model, d_model), jnp.float32, -bound, bound)

    def b(kk):
        return jax.random.uniform(kk, (1, d_model), jnp.float32, -bound, bound)

    ref_params = {
        "w_q": w(keys[0]), "b_q": b(keys[1]),
        "w_k": w(keys[2]), "b_k": b(keys[3]),
        "w_v": w(keys[4]), "b_v": b(keys[5]),
        "w_out": w(keys[6]), "b_out": b(keys[7]),
    }

    scale = 1.0 / math.sqrt(d_model // n_heads)
    wq_s, bq_s = ref_params["w_q"] * scale, ref_params["b_q"] * scale
    kern_params = {
        "w_q": wq_s.astype(jnp.bfloat16), "b_q": bq_s,
        "w_k": ref_params["w_k"].astype(jnp.bfloat16), "b_k": ref_params["b_k"],
        "w_v": ref_params["w_v"].astype(jnp.bfloat16), "b_v": ref_params["b_v"],
        "w_qkv": jnp.concatenate(
            [wq_s, ref_params["w_k"], ref_params["w_v"]], axis=1).astype(jnp.bfloat16),
        "b_qkv": jnp.concatenate(
            [bq_s, ref_params["b_k"], ref_params["b_v"]], axis=1),
        "w_out": ref_params["w_out"].astype(jnp.bfloat16), "b_out": ref_params["b_out"],
    }
    return ref_params, kern_params


# ---------------------------------------------------------------------------
# Pure-JAX f32 reference (mirrors the PyTorch module)
# ---------------------------------------------------------------------------
def ref_forward(params, q, k, v, n_heads):
    B, S, D = q.shape
    n_d = D // n_heads

    def lin(x, w, b):
        return x @ w + b

    def heads(x):
        return x.reshape(B, S, n_heads, n_d).transpose(0, 2, 1, 3)

    Q = heads(lin(q, params["w_q"], params["b_q"]))
    K = heads(lin(k, params["w_k"], params["b_k"]))
    V = heads(lin(v, params["w_v"], params["b_v"]))
    s = (Q @ K.transpose(0, 1, 3, 2)) / math.sqrt(n_d)
    mask = jnp.tril(jnp.ones((S, S), bool))
    s = jnp.where(mask, s, -jnp.inf)
    p = jax.nn.softmax(s, axis=-1)
    o = (p @ V).transpose(0, 2, 1, 3).reshape(B, S, D)
    return lin(o, params["w_out"], params["b_out"])


if __name__ == "__main__":
    # --- small cross-attention test (merged-head loop kernel, fused QKV path) ---
    batch, seq_len, d_model, n_heads = 2, 8, 32, 4
    root = jax.random.PRNGKey(0)
    k_params, k_q, k_k, k_v = jax.random.split(root, 4)
    ref_params, kern_params = init_params(k_params, d_model, n_heads)

    q = jax.random.normal(k_q, (batch, seq_len, d_model), jnp.float32)
    k = jax.random.normal(k_k, (batch, seq_len, d_model), jnp.float32)
    v = jax.random.normal(k_v, (batch, seq_len, d_model), jnp.float32)

    out = multi_head_attention_forward(kern_params, q, k, v, n_heads)
    jax.block_until_ready(out)
    ref = ref_forward(ref_params, q, k, v, n_heads)
    tol = 5e-2 * max(1.0, float(jnp.max(jnp.abs(ref))))
    err = float(jnp.max(jnp.abs(out - ref)))
    assert err < tol, f"small test mismatch vs reference: {err} >= {tol}"

    # --- mid-size self-attention test: exercises the head-grid flash path
    #     (n_d = 128), causal block skipping + clamped K/V DMA, diagonal-only
    #     masking, and the (8,128)-aligned tiled projections / fused QKV GEMM ---
    B2, S2, D2, H2 = 1, 1024, 512, 4
    kp2, kx2 = jax.random.split(jax.random.PRNGKey(1))
    ref_p2, kern_p2 = init_params(kp2, D2, H2)
    x2 = jax.random.normal(kx2, (B2, S2, D2), jnp.float32)

    out2 = multi_head_attention_forward(kern_p2, x2, x2, x2, H2)
    jax.block_until_ready(out2)
    ref2 = ref_forward(ref_p2, x2, x2, x2, H2)
    tol2 = 5e-2 * max(1.0, float(jnp.max(jnp.abs(ref2))))
    err2 = float(jnp.max(jnp.abs(out2 - ref2)))
    assert err2 < tol2, f"mid test mismatch vs reference: {err2} >= {tol2}"

    print("KERNEL_OK")
</pallas_src>

<mosaic_0001>
module attributes {stable_mosaic.version = 11 : i64} {
  func.func @_fused_qkv_kernel(%arg0: i32, %arg1: i32, %arg2: memref<16x32xbf16, #tpu.memory_space<vmem>>, %arg3: memref<16x32xbf16, #tpu.memory_space<vmem>>, %arg4: memref<16x32xbf16, #tpu.memory_space<vmem>>, %arg5: memref<32x32xbf16, #tpu.memory_space<vmem>>, %arg6: memref<32x32xbf16, #tpu.memory_space<vmem>>, %arg7: memref<32x32xbf16, #tpu.memory_space<vmem>>, %arg8: memref<1x32xf32, #tpu.memory_space<vmem>>, %arg9: memref<1x32xf32, #tpu.memory_space<vmem>>, %arg10: memref<1x32xf32, #tpu.memory_space<vmem>>, %arg11: memref<16x32xbf16, #tpu.memory_space<vmem>>, %arg12: memref<16x32xbf16, #tpu.memory_space<vmem>>, %arg13: memref<16x32xbf16, #tpu.memory_space<vmem>>) attributes {dimension_semantics = [#tpu.dimension_semantics<parallel>, #tpu.dimension_semantics<parallel>], iteration_bounds = array<i64: 1, 1>, scalar_prefetch = 0 : i64, scratch_operands = 0 : i64, tpu.core_type = #tpu.core_type<tc>, window_params = [{transform_indices = @transform_0, window_bounds = array<i64: 16, 32>}, {transform_indices = @transform_1, window_bounds = array<i64: 16, 32>}, {transform_indices = @transform_2, window_bounds = array<i64: 16, 32>}, {transform_indices = @transform_3, window_bounds = array<i64: 32, 32>}, {transform_indices = @transform_4, window_bounds = array<i64: 32, 32>}, {transform_indices = @transform_5, window_bounds = array<i64: 32, 32>}, {transform_indices = @transform_6, window_bounds = array<i64: 1, 32>}, {transform_indices = @transform_7, window_bounds = array<i64: 1, 32>}, {transform_indices = @transform_8, window_bounds = array<i64: 1, 32>}, {transform_indices = @transform_9, window_bounds = array<i64: 16, 32>}, {transform_indices = @transform_10, window_bounds = array<i64: 16, 32>}, {transform_indices = @transform_11, window_bounds = array<i64: 16, 32>}]} {
    %c0 = arith.constant 0 : index
    %c0_0 = arith.constant 0 : index
    %0 = vector.load %arg2[%c0, %c0_0] : memref<16x32xbf16, #tpu.memory_space<vmem>>, vector<16x32xbf16>
    %c0_1 = arith.constant 0 : index
    %c0_2 = arith.constant 0 : index
    %1 = vector.load %arg5[%c0_1, %c0_2] : memref<32x32xbf16, #tpu.memory_space<vmem>>, vector<32x32xbf16>
    %cst = arith.constant dense<0.000000e+00> : vector<16x32xf32>
    %2 = tpu.matmul %0, %1, %cst {dimension_numbers = #tpu.dot_dimension_numbers<[1], [0], [0], [1], [0, 0, 1, 1], [], []>} : vector<16x32xbf16>, vector<32x32xbf16>, vector<16x32xf32> -> vector<16x32xf32>
    %c0_3 = arith.constant 0 : index
    %c0_4 = arith.constant 0 : index
    %3 = vector.load %arg8[%c0_3, %c0_4] : memref<1x32xf32, #tpu.memory_space<vmem>>, vector<1x32xf32>
    %4 = vector.broadcast %3 : vector<1x32xf32> to vector<16x32xf32>
    %5 = arith.addf %2, %4 : vector<16x32xf32>
    %6 = arith.truncf %5 : vector<16x32xf32> to vector<16x32xbf16>
    %c0_5 = arith.constant 0 : index
    %c0_6 = arith.constant 0 : index
    %7 = vector.load %arg11[%c0_5, %c0_6] : memref<16x32xbf16, #tpu.memory_space<vmem>>, vector<16x32xbf16>
    tpu.vector_store %arg11[%c0_5, %c0_6], %6 {strides = array<i32>} : memref<16x32xbf16, #tpu.memory_space<vmem>>, vector<16x32xbf16>,
    %c0_7 = arith.constant 0 : index
    %c0_8 = arith.constant 0 : index
    %8 = vector.load %arg3[%c0_7, %c0_8] : memref<16x32xbf16, #tpu.memory_space<vmem>>, vector<16x32xbf16>
    %c0_9 = arith.constant 0 : index
    %c0_10 = arith.constant 0 : index
    %9 = vector.load %arg6[%c0_9, %c0_10] : memref<32x32xbf16, #tpu.memory_space<vmem>>, vector<32x32xbf16>
    %cst_11 = arith.constant dense<0.000000e+00> : vector<16x32xf32>
    %10 = tpu.matmul %8, %9, %cst_11 {dimension_numbers = #tpu.dot_dimension_numbers<[1], [0], [0], [1], [0, 0, 1, 1], [], []>} : vector<16x32xbf16>, vector<32x32xbf16>, vector<16x32xf32> -> vector<16x32xf32>
    %c0_12 = arith.constant 0 : index
    %c0_13 = arith.constant 0 : index
    %11 = vector.load %arg9[%c0_12, %c0_13] : memref<1x32xf32, #tpu.memory_space<vmem>>, vector<1x32xf32>
    %12 = vector.broadcast %11 : vector<1x32xf32> to vector<16x32xf32>
    %13 = arith.addf %10, %12 : vector<16x32xf32>
    %14 = arith.truncf %13 : vector<16x32xf32> to vector<16x32xbf16>
    %c0_14 = arith.constant 0 : index
    %c0_15 = arith.constant 0 : index
    %15 = vector.load %arg12[%c0_14, %c0_15] : memref<16x32xbf16, #tpu.memory_space<vmem>>, vector<16x32xbf16>
    tpu.vector_store %arg12[%c0_14, %c0_15], %14 {strides = array<i32>} : memref<16x32xbf16, #tpu.memory_space<vmem>>, vector<16x32xbf16>,
    %c0_16 = arith.constant 0 : index
    %c0_17 = arith.constant 0 : index
    %16 = vector.load %arg4[%c0_16, %c0_17] : memref<16x32xbf16, #tpu.memory_space<vmem>>, vector<16x32xbf16>
    %c0_18 = arith.constant 0 : index
    %c0_19 = arith.constant 0 : index
    %17 = vector.load %arg7[%c0_18, %c0_19] : memref<32x32xbf16, #tpu.memory_space<vmem>>, vector<32x32xbf16>
    %cst_20 = arith.constant dense<0.000000e+00> : vector<16x32xf32>
    %18 = tpu.matmul %16, %17, %cst_20 {dimension_numbers = #tpu.dot_dimension_numbers<[1], [0], [0], [1], [0, 0, 1, 1], [], []>} : vector<16x32xbf16>, vector<32x32xbf16>, vector<16x32xf32> -> vector<16x32xf32>
    %c0_21 = arith.constant 0 : index
    %c0_22 = arith.constant 0 : index
    %19 = vector.load %arg10[%c0_21, %c0_22] : memref<1x32xf32, #tpu.memory_space<vmem>>, vector<1x32xf32>
    %20 = vector.broadcast %19 : vector<1x32xf32> to vector<16x32xf32>
    %21 = arith.addf %18, %20 : vector<16x32xf32>
    %22 = arith.truncf %21 : vector<16x32xf32> to vector<16x32xbf16>
    %c0_23 = arith.constant 0 : index
    %c0_24 = arith.constant 0 : index
    %23 = vector.load %arg13[%c0_23, %c0_24] : memref<16x32xbf16, #tpu.memory_space<vmem>>, vector<16x32xbf16>
    tpu.vector_store %arg13[%c0_23, %c0_24], %22 {strides = array<i32>} : memref<16x32xbf16, #tpu.memory_space<vmem>>, vector<16x32xbf16>,
    return
  }
  func.func @transform_0(%arg0: i32, %arg1: i32) -> (i32, i32) {
    %c0_i32 = arith.constant 0 : i32
    %c0_i32_0 = arith.constant 0 : i32
    return %arg0, %c0_i32 : i32, i32
  }
  func.func @transform_1(%arg0: i32, %arg1: i32) -> (i32, i32) {
    %c0_i32 = arith.constant 0 : i32
    %c0_i32_0 = arith.constant 0 : i32
    return %arg0, %c0_i32 : i32, i32
  }
  func.func @transform_2(%arg0: i32, %arg1: i32) -> (i32, i32) {
    %c0_i32 = arith.constant 0 : i32
    %c0_i32_0 = arith.constant 0 : i32
    return %arg0, %c0_i32 : i32, i32
  }
  func.func @transform_3(%arg0: i32, %arg1: i32) -> (i32, i32) {
    %c0_i32 = arith.constant 0 : i32
    %c0_i32_0 = arith.constant 0 : i32
    return %c0_i32, %arg1 : i32, i32
  }
  func.func @transform_4(%arg0: i32, %arg1: i32) -> (i32, i32) {
    %c0_i32 = arith.constant 0 : i32
    %c0_i32_0 = arith.constant 0 : i32
    return %c0_i32, %arg1 : i32, i32
  }
  func.func @transform_5(%arg0: i32, %arg1: i32) -> (i32, i32) {
    %c0_i32 = arith.constant 0 : i32
    %c0_i32_0 = arith.constant 0 : i32
    return %c0_i32, %arg1 : i32, i32
  }
  func.func @transform_6(%arg0: i32, %arg1: i32) -> (i32, i32) {
    %c0_i32 = arith.constant 0 : i32
    %c0_i32_0 = arith.constant 0 : i32
    return %c0_i32, %arg1 : i32, i32
  }
  func.func @transform_7(%arg0: i32, %arg1: i32) -> (i32, i32) {
    %c0_i32 = arith.constant 0 : i32
    %c0_i32_0 = arith.constant 0 : i32
    return %c0_i32, %arg1 : i32, i32
  }
  func.func @transform_8(%arg0: i32, %arg1: i32) -> (i32, i32) {
    %c0_i32 = arith.constant 0 : i32
    %c0_i32_0 = arith.constant 0 : i32
    return %c0_i32, %arg1 : i32, i32
  }
  func.func @transform_9(%arg0: i32, %arg1: i32) -> (i32, i32) {
    %c0_i32 = arith.constant 0 : i32
    return %arg0, %arg1 : i32, i32
  }
  func.func @transform_10(%arg0: i32, %arg1: i32) -> (i32, i32) {
    %c0_i32 = arith.constant 0 : i32
    return %arg0, %arg1 : i32, i32
  }
  func.func @transform_11(%arg0: i32, %arg1: i32) -> (i32, i32) {
    %c0_i32 = arith.constant 0 : i32
    return %arg0, %arg1 : i32, i32
  }
}

</mosaic_0001>

<bundles_post_ra>
// kernel: tpu_custom_call.1
= control target key start
LH: loop header
LB: loop body
LE: loop exit
PB: predicated region body
PF: predicated region fallthrough
CT: control target
= control target key end

     0   :  { %17 = vsyncpa [#allocation3], 0  ;;  %s914_s0 = inlined_call_operand.hbm [shape: bf16[16,32], index: 0, kind: input, shape index: {}]   ;;  %s915_s1 = inlined_call_operand.hbm [shape: bf16[16,32], index: 1, kind: input, shape index: {}]   ;;  %s916_s2 = inlined_call_operand.hbm [shape: bf16[16,32], index: 2, kind: input, shape index: {}]   ;;  %s917_s3 = inlined_call_operand.hbm [shape: bf16[32,32], index: 3, kind: input, shape index: {}]   ;;  %s918_s4 = inlined_call_operand.hbm [shape: bf16[32,32], index: 4, kind: input, shape index: {}]   ;;  %s919_s5 = inlined_call_operand.vmem [shape: bf16[32,32], index: 5, kind: input, shape index: {}]   ;;  %s920_s6 = inlined_call_operand.vmem [shape: f32[1,32], index: 6, kind: input, shape index: {}]   ;;  %s921_s7 = inlined_call_operand.vmem [shape: f32[1,32], index: 7, kind: input, shape index: {}]   ;;  %s922_s8 = inlined_call_operand.vmem [shape: f32[1,32], index: 8, kind: input, shape index: {}]   ;;  %s923_s9 = inlined_call_operand.hbm [shape: bf16[16,32], index: 9, kind: output, shape index: {0}]   ;;  %s924_s10 = inlined_call_operand.hbm [shape: bf16[16,32], index: 10, kind: output, shape index: {1}]   ;;  %s925_s11 = inlined_call_operand.hbm [shape: bf16[16,32], index: 11, kind: output, shape index: {2}]  }
   0x1   :  { %18 = vsyncpa [#allocation6], 0 }
   0x2   :  { %19 = vsyncpa [#allocation9], 0 }
   0x3   :  { %20 = vsyncpa [#allocation4], 0 }
   0x4   :  { %21 = vsyncpa [#allocation13], 0  ;;  %s677_s17 = smov [#allocation5]   ;;  %s678_s19 = smov [#allocation8]  }
   0x5   :  { %s39_s18 = sshll.u32 %s677_s17, 4  ;;  %s63_s20 = sshll.u32 %s678_s19, 4  ;;  %s40_s18 = int_to_ptr.vmem [resolvable:$true] %s39_s18  ;;  %s749_s20 = int_to_ptr.vmem [resolvable:$true] %s63_s20 }
   0x6   :  { %s491_s23 = scalar_lea.hbm %s915_s1, 128 }
   0x7   :  { %p492_p0 = scmp.ne.s32.totalorder %s915_s1, %s491_s23  ;;  %p495_p1 = scmp.lt.u32.totalorder %s491_s23, %s915_s1 }
   0x9   :  { %p497_p2 = pnand %p495_p1, %p492_p0 }
   0xb   :  { %500 = shalt.err (!%p497_p2)
}
   0xc   :  { %s501_s28 = scalar_lea.vmem %s40_s18, 128  ;;  %p506_p4 = scmp.lt.s32.totalorder %s40_s18, %s40_s18 }
   0xd   :  { %p502_p3 = scmp.ne.s32.totalorder %s40_s18, %s501_s28  ;;  %p507_p5 = scmp.lt.s32.totalorder %s501_s28, %s501_s28 }
   0xf   :  { %p508_p6 = por %p507_p5, %p506_p4 }
  0x11   :  { %p509_p7 = pnand %p508_p6, %p502_p3 }
  0x13   :  { %512 = shalt.err (!%p509_p7)
}
  0x14   :  { %s679_s29 = smov 64   ;;  %s680_s30 = smov 4  }
  0x15   :  { %45 = dma.hbm_to_vmem [thread:$0]  %s915_s1, 128, %s40_s18, [#allocation6], %s679_s29, %s679_s29, %s680_s30  }
  0x16   :  { %s513_s16 = scalar_lea.hbm %s917_s3, 256 }
  0x17   :  { %p514_p8 = scmp.ne.s32.totalorder %s917_s3, %s513_s16  ;;  %p517_p9 = scmp.lt.u32.totalorder %s513_s16, %s917_s3 }
  0x19   :  { %p519_p10 = pnand %p517_p9, %p514_p8 }
  0x1b   :  { %522 = shalt.err (!%p519_p10)
}
  0x1c   :  { %s523_s23 = scalar_lea.vmem %s749_s20, 256  ;;  %p528_p12 = scmp.lt.s32.totalorder %s749_s20, %s749_s20 }
  0x1d   :  { %p524_p11 = scmp.ne.s32.totalorder %s749_s20, %s523_s23  ;;  %p529_p13 = scmp.lt.s32.totalorder %s523_s23, %s523_s23 }
  0x1f   :  { %p530_p0 = por %p529_p13, %p528_p12 }
  0x21   :  { %p531_p1 = pnand %p530_p0, %p524_p11 }
  0x23   :  { %534 = shalt.err (!%p531_p1)
}
  0x24   :  { %69 = dma.hbm_to_vmem [thread:$0]  %s917_s3, 256, %s749_s20, [#allocation9], %s679_s29, %s679_s29, %s680_s30  }
  0x25   :  { %s681_s24 = smov [#allocation2]   ;;  %s682_s26 = smov [#allocation7]  }
  0x26   :  { %s27_s25 = sshll.u32 %s681_s24, 4  ;;  %s51_s27 = sshll.u32 %s682_s26, 4  ;;  %s28_s25 = int_to_ptr.vmem [resolvable:$true] %s27_s25  ;;  %s786_s27 = int_to_ptr.vmem [resolvable:$true] %s51_s27 }
  0x27   :  { %s535_s13 = scalar_lea.hbm %s914_s0, 128 }
  0x28   :  { %p536_p2 = scmp.ne.s32.totalorder %s914_s0, %s535_s13  ;;  %p539_p3 = scmp.lt.u32.totalorder %s535_s13, %s914_s0 }
  0x2a   :  { %p541_p4 = pnand %p539_p3, %p536_p2 }
  0x2c   :  { %544 = shalt.err (!%p541_p4)
}
  0x2d   :  { %s545_s3 = scalar_lea.vmem %s28_s25, 128  ;;  %p550_p6 = scmp.lt.s32.totalorder %s28_s25, %s28_s25 }
  0x2e   :  { %p546_p5 = scmp.ne.s32.totalorder %s28_s25, %s545_s3  ;;  %p551_p7 = scmp.lt.s32.totalorder %s545_s3, %s545_s3 }
  0x30   :  { %p552_p8 = por %p551_p7, %p550_p6 }
  0x32   :  { %p553_p9 = pnand %p552_p8, %p546_p5 }
  0x34   :  { %556 = shalt.err (!%p553_p9)
}
  0x35   :  { %33 = dma.hbm_to_vmem [thread:$0]  %s914_s0, 128, %s28_s25, [#allocation3], %s679_s29, %s679_s29, %s680_s30  }
  0x36   :  { %s557_s23 = scalar_lea.hbm %s916_s2, 128 }
  0x37   :  { %p558_p10 = scmp.ne.s32.totalorder %s916_s2, %s557_s23  ;;  %p561_p11 = scmp.lt.u32.totalorder %s557_s23, %s916_s2 }
  0x39   :  { %p563_p12 = pnand %p561_p11, %p558_p10 }
  0x3b   :  { %566 = shalt.err (!%p563_p12)
}
  0x3c   :  { %s567_s28 = scalar_lea.vmem %s786_s27, 128  ;;  %p572_p0 = scmp.lt.s32.totalorder %s786_s27, %s786_s27 }
  0x3d   :  { %p568_p13 = scmp.ne.s32.totalorder %s786_s27, %s567_s28  ;;  %p573_p1 = scmp.lt.s32.totalorder %s567_s28, %s567_s28 }
  0x3f   :  { %p574_p2 = por %p573_p1, %p572_p0 }
  0x41   :  { %p575_p3 = pnand %p574_p2, %p568_p13 }
  0x43   :  { %578 = shalt.err (!%p575_p3)
}
  0x44   :  { %57 = dma.hbm_to_vmem [thread:$0]  %s916_s2, 128, %s786_s27, [#allocation6], %s679_s29, %s679_s29, %s680_s30  }
  0x45   :  { %s683_s12 = smov [#allocation10]   ;;  %s579_s16 = scalar_lea.hbm %s918_s4, 256 }
  0x46   :  { %s75_s13 = sshll.u32 %s683_s12, 4  ;;  %p580_p4 = scmp.ne.s32.totalorder %s918_s4, %s579_s16  ;;  %s76_s13 = int_to_ptr.vmem [resolvable:$true] %s75_s13 }
  0x47   :  { %p583_p5 = scmp.lt.u32.totalorder %s579_s16, %s918_s4 }
  0x49   :  { %p585_p6 = pnand %p583_p5, %p580_p4 }
  0x4b   :  { %588 = shalt.err (!%p585_p6)
}
  0x4c   :  { %s589_s21 = scalar_lea.vmem %s76_s13, 256  ;;  %p594_p8 = scmp.lt.s32.totalorder %s76_s13, %s76_s13 }
  0x4d   :  { %p590_p7 = scmp.ne.s32.totalorder %s76_s13, %s589_s21  ;;  %p595_p9 = scmp.lt.s32.totalorder %s589_s21, %s589_s21 }
  0x4f   :  { %p596_p10 = por %p595_p9, %p594_p8 }
  0x51   :  { %p597_p11 = pnand %p596_p10, %p590_p7 }
  0x53   :  { %600 = shalt.err (!%p597_p11)
}
  0x54   :  { %81 = dma.hbm_to_vmem [thread:$0]  %s918_s4, 256, %s76_s13, [#allocation9], %s679_s29, %s679_s29, %s680_s30  }
  0x55   :  { %667 = dma.done.wait [#allocation3], 128  }
  0x56   :  { %668 = vsyncadd [#allocation3], 4294967168 }
  0x57   :  { %669 = dma.done.wait [#allocation6], 256  }
  0x58   :  { %670 = vsyncadd [#allocation6], 4294967040 }
  0x59   :  { %671 = dma.done.wait [#allocation9], 512  }
  0x5a   :  { %672 = vsyncadd [#allocation9], 4294966784  ;;  %v684_v0 = vmov 0.0   ;;  %vm685_vm0 = vmmov 0   ;;  %v482_v1 = vld [vmem:[#allocation8] sm:$0xff]   ;;  %v483_v2 = vld [vmem:[#allocation8 + $0x8] sm:$0xff]  }
  0x5b   :  { %446 = vmatprep.subr.bf16.mxu0 %v684_v0  ;;  %454 = vmatprep.subr.bf16.mxu1 %v684_v0  ;;  %v484_v3 = vld [vmem:[#allocation10] sm:$0xff]   ;;  %v485_v4 = vld [vmem:[#allocation2] sm:$0xff]   ;;  %v487_v5 = vld [vmem:[#allocation10 + $0x8] sm:$0xff]   ;;  %vm136_vm1 = vcmask 261120   ;;  %vm189_vm2 = vcmask 257024   ;;  %s687_s25 = smov [#allocation12]  }
  0x5c   :  { %450 = vmatprep.mubr.msk.bf16.mxu0 %vm685_vm0, %v684_v0  ;;  %458 = vmatprep.mubr.msk.bf16.mxu1 %vm685_vm0, %v684_v0  ;;  %v486_v6 = vld [vmem:[%s919_s5] sm:$0xff]   ;;  %v488_v7 = vld [vmem:[#allocation5] sm:$0xff]   ;;  %v489_v8 = vld [vmem:[%s919_s5 + $0x8] sm:$0xff]   ;;  %s686_s5 = smov [#allocation11]  }
  0x5d   :  { %447 = vmatpush3.bf16.msra.mxu0 %v482_v1  ;;  %455 = vmatpush3.bf16.msra.mxu1 %v484_v3  ;;  %v490_v9 = vld [vmem:[#allocation7] sm:$0xff]   ;;  %s365_s0 = sshll.u32 %s686_s5, 4  ;;  %s366_s0 = int_to_ptr.vmem [resolvable:$true] %s365_s0 }
  0x5e   :  { %448 = vmatprep.subr.bf16.mxu0 %v684_v0  ;;  %456 = vmatprep.subr.bf16.mxu1 %v684_v0  ;;  %v410_v10 = vld [vmem:[%s920_s6] ss:$0 sm:$0xff]  ;;  %s377_s6 = sshll.u32 %s687_s25, 4  ;;  %s601_s13 = scalar_lea.vmem %s366_s0, 128  ;;  %s859_s6 = int_to_ptr.vmem [resolvable:$true] %s377_s6 }
  0x5f   :  { %v417_v12 = vld [vmem:[%s921_s7] ss:$0 sm:$0xff]  ;;  %p602_p12 = scmp.ne.s32.totalorder %s366_s0, %s601_s13  ;;  %p606_p13 = scmp.lt.s32.totalorder %s366_s0, %s366_s0 }
  0x60   :  { %v424_v27 = vld [vmem:[%s922_s8] ss:$0 sm:$0xff]  ;;  %p607_p0 = scmp.lt.s32.totalorder %s601_s13, %s601_s13 }
  0x61   :  { %449 = vmatpush3.bf16.msra.mxu0 %v483_v2  ;;  %457 = vmatpush3.bf16.msra.mxu1 %v487_v5 }
  0x62   :  { %462 = vmatprep.subr.bf16.mxu0 %v684_v0  ;;  %p608_p1 = por %p607_p0, %p606_p13 }
  0x64   :  { %451 = vmatmul.mubr.msk.bf16.vlgmr.msra.gmra.mrb[0].mxu0 %vm136_vm1, %v485_v4  ;;  %459 = vmatmul.mubr.msk.bf16.vlgmr.msra.gmra.mrb[0].mxu1 %vm136_vm1, %v488_v7  ;;  %p609_p2 = pnand %p608_p1, %p602_p12 }
  0x65   :  { %463 = vmatpush3.bf16.msra.mxu0 %v486_v6  ;;  %466 = vmatprep.mubr.msk.bf16.mxu0 %vm685_vm0, %v684_v0 }
  0x66   :  { %464 = vmatprep.subr.bf16.mxu0 %v684_v0 }
  0x69   :  { %465 = vmatpush3.bf16.msra.mxu0 %v489_v8 }
  0x6c   :  { %467 = vmatmul.mubr.msk.bf16.vlgmr.msra.gmra.mrb[4].mxu0 %vm136_vm1, %v490_v9 }
 0x137   :  { %v174_v11 = vpop.f32.mrb[0].mxu0  ;;  %v259_v16 = vpop.f32.mrb[0].mxu1 }
 0x138   :  { %v175_v13 = vadd.f32 %v410_v10, %v174_v11  ;;  %v452_v14 = vpop.f32.mrb[1].mxu0  ;;  %v260_v20 = vadd.f32 %v417_v12, %v259_v16  ;;  %v460_v21 = vpop.f32.mrb[1].mxu1 }
 0x139   :  { %v177_v15 = vpop.f32.mrb[2].mxu0  ;;  %v262_v22 = vpop.f32.mrb[2].mxu1 }
 0x13a   :  { %v431_v17 = vpack.c.bf16 %v175_v13, %v175_v13  ;;  %v178_v18 = vadd.f32 %v410_v10, %v177_v15  ;;  %v453_v19 = vpop.f32.mrb[3].mxu0  ;;  %v433_v24 = vpack.c.bf16 %v260_v20, %v260_v20  ;;  %v263_v25 = vadd.f32 %v417_v12, %v262_v22  ;;  %v461_v26 = vpop.f32.mrb[3].mxu1 }
 0x13c   :  { %v432_v23 = vpack.c.bf16 %v178_v18, %v178_v18  ;;  %190 = vst.msk [vmem:[#allocation11] sm:$0xf] %vm189_vm2, %v431_v17  ;;  %v434_v28 = vpack.c.bf16 %v263_v25, %v263_v25  ;;  %274 = vst.msk [vmem:[#allocation12] sm:$0xf] %vm189_vm2, %v433_v24 }
 0x13e   :  { %191 = vst.msk [vmem:[#allocation11 + $0x4] sm:$0xf] %vm189_vm2, %v432_v23 }
 0x13f   :  { %v343_v29 = vpop.f32.mrb[4].mxu0 }
 0x140   :  { %612 = shalt.err (!%p609_p2)
}
 0x141   :  { %s613_s16 = scalar_lea.hbm %s923_s9, 128 }
 0x142   :  { %p614_p3 = scmp.ne.s32.totalorder %s923_s9, %s613_s16  ;;  %p617_p4 = scmp.lt.u32.totalorder %s613_s16, %s923_s9 }
 0x144   :  { %p619_p5 = pnand %p617_p4, %p614_p3 }
 0x146   :  { %622 = shalt.err (!%p619_p5)
}
 0x147   :  { %371 = dma.vmem_to_hbm [thread:$0]  %s366_s0, 128, %s923_s9, [#allocation4], %s679_s29, %s679_s29, %s680_s30   ;;  %v344_v30 = vadd.f32 %v424_v27, %v343_v29  ;;  %275 = vst.msk [vmem:[#allocation12 + $0x4] sm:$0xf] %vm189_vm2, %v434_v28  ;;  %v468_v31 = vpop.f32.mrb[5].mxu0 }
 0x148   :  { %s688_s2 = smov [#allocation14]   ;;  %v346_v32 = vpop.f32.mrb[6].mxu0  ;;  %s623_s4 = scalar_lea.vmem %s859_s6, 128 }
 0x149   :  { %s389_s27 = sshll.u32 %s688_s2, 4  ;;  %p624_p6 = scmp.ne.s32.totalorder %s859_s6, %s623_s4  ;;  %s390_s27 = int_to_ptr.vmem [resolvable:$true] %s389_s27 }
 0x14a   :  { %p628_p7 = scmp.lt.s32.totalorder %s859_s6, %s859_s6  ;;  %p629_p8 = scmp.lt.s32.totalorder %s623_s4, %s623_s4 }
 0x14c   :  { %p630_p9 = por %p629_p8, %p628_p7 }
 0x14e   :  { %p631_p10 = pnand %p630_p9, %p624_p6 }
 0x150   :  { %634 = shalt.err (!%p631_p10)
}
 0x151   :  { %s635_s1 = scalar_lea.hbm %s924_s10, 128 }
 0x152   :  { %p636_p11 = scmp.ne.s32.totalorder %s924_s10, %s635_s1  ;;  %p639_p12 = scmp.lt.u32.totalorder %s635_s1, %s924_s10 }
 0x154   :  { %p641_p13 = pnand %p639_p12, %p636_p11 }
 0x156   :  { %644 = shalt.err (!%p641_p13)
}
 0x157   :  { %383 = dma.vmem_to_hbm [thread:$0]  %s859_s6, 128, %s924_s10, [#allocation13], %s679_s29, %s679_s29, %s680_s30   ;;  %v435_v33 = vpack.c.bf16 %v344_v30, %v344_v30  ;;  %v347_v34 = vadd.f32 %v424_v27, %v346_v32  ;;  %v469_v35 = vpop.f32.mrb[7].mxu0 }
 0x158   :  { %s645_s0 = scalar_lea.vmem %s390_s27, 128  ;;  %p650_p1 = scmp.lt.s32.totalorder %s390_s27, %s390_s27 }
 0x159   :  { %358 = vst.msk [vmem:[#allocation14] sm:$0xf] %vm189_vm2, %v435_v33  ;;  %v436_v36 = vpack.c.bf16 %v347_v34, %v347_v34  ;;  %p646_p0 = scmp.ne.s32.totalorder %s390_s27, %s645_s0  ;;  %p651_p2 = scmp.lt.s32.totalorder %s645_s0, %s645_s0 }
 0x15b   :  { %359 = vst.msk [vmem:[#allocation14 + $0x4] sm:$0xf] %vm189_vm2, %v436_v36  ;;  %p652_p3 = por %p651_p2, %p650_p1 }
 0x15d   :  { %p653_p4 = pnand %p652_p3, %p646_p0 }
 0x15f   :  { %656 = shalt.err (!%p653_p4)
}
 0x160   :  { %s657_s10 = scalar_lea.hbm %s925_s11, 128 }
 0x161   :  { %p658_p5 = scmp.ne.s32.totalorder %s925_s11, %s657_s10  ;;  %p661_p6 = scmp.lt.u32.totalorder %s657_s10, %s925_s11 }
 0x163   :  { %p663_p7 = pnand %p661_p6, %p658_p5 }
 0x165   :  { %666 = shalt.err (!%p663_p7)
}
 0x166   :  { %395 = dma.vmem_to_hbm [thread:$0]  %s390_s27, 128, %s925_s11, [#allocation13], %s679_s29, %s679_s29, %s680_s30  }
 0x167   :  { %673 = dma.done.wait [#allocation4], 128  }
 0x168   :  { %674 = vsyncadd [#allocation4], 4294967168 }
 0x169   :  { %675 = dma.done.wait [#allocation13], 256  }
 0x16a   :  { %676 = vsyncadd [#allocation13], 4294967040 }
 0x16b   :  { %405 = vsyncpa [#allocation3], 1 }
 0x16c   :  { %406 = vsyncpa [#allocation6], 1 }
 0x16d   :  { %407 = vsyncpa [#allocation9], 1 }
 0x16e   :  { %408 = vsyncpa [#allocation4], 1 }
 0x16f   :  { %409 = vsyncpa [#allocation13], 1 }

</bundles_post_ra>
